<compile_context>
chip_gen: v5e
topology: v5e:2x2
jax: 0.10.0
libtpu: 0.0.40
codegen_flags: <defaults>
</compile_context>

<pallas_src>
import math

import jax
import jax.numpy as jnp
from jax import lax
from jax.experimental import pallas as pl
from jax.experimental.pallas import tpu as pltpu


def iclassifier_fc_kernel(feats_ref, w_ref, b_ref, ct_ref):
    # ct[C, tm] = W[C, D] @ feats[tm, D]^T + b[C, 1]
    # Lane-dense output: the last dim is the 128-aligned row tile, so the store is a
    # full-width vst (no masked / strided writeback for the tiny class dim).
    ct_ref[...] = (
        lax.dot_general(
            w_ref[...],
            feats_ref[...],
            dimension_numbers=(((1,), (1,)), ((), ())),   # contract on D
            preferred_element_type=jnp.float32,
        )
        + b_ref[...]
    )


def _pick_row_tile(n, d, itemsize, tm_request):
    """Largest 128-aligned row tile fitting the VMEM budget; >=2 grid steps when easy."""
    # Budget the double-buffered feats stream (2 * tm * d * itemsize) against v5e's
    # 16 MiB default scoped VMEM (the smallest default across v5e/v6e/v7x), leaving
    # headroom for the resident W/b, the output tile and compiler scratch.
    budget = 12 << 20
    tm = max(128, (tm_request // 128) * 128)
    while tm > 128 and 2 * tm * d * itemsize > budget:
        tm //= 2
    if tm >= n:
        if n % 256 == 0:
            # Split into two 128-aligned tiles so v7x's two TensorCores both stream.
            tm = n // 2
        else:
            # Single tile; pad rows up to a sublane multiple of 8 (handled by caller).
            tm = max(8, -(-n // 8) * 8)
    return tm


def iclassifier_forward(x, w, b, *, tm=1024, stream_dtype=None):
    """IClassifier.forward (feature_extractor == Identity / precomputed features).

    x: [N, ...]  ->  (feats [N, D], c [N, C])
    w: [C, D]  (torch nn.Linear.weight layout),  b: [C]
    stream_dtype: optional dtype (e.g. jnp.bfloat16) to stream feats through the
      kernel at half the HBM bytes; the returned feats and the MXU accumulate stay f32.
    """
    n = x.shape[0]
    feats = x.reshape(n, -1)            # feats.view(N, -1): zero-copy view, like torch
    d = feats.shape[1]
    c_dim = w.shape[0]

    feats_in = feats if stream_dtype is None else feats.astype(stream_dtype)
    itemsize = jnp.dtype(feats_in.dtype).itemsize

    tm = _pick_row_tile(n, d, itemsize, tm)
    n_pad = pl.cdiv(n, tm) * tm
    if n_pad != n:
        feats_in = jnp.pad(feats_in, ((0, n_pad - n), (0, 0)))

    w_f32 = w.astype(jnp.float32)
    b_col = b.reshape(c_dim, 1).astype(jnp.float32)

    ct = pl.pallas_call(
        iclassifier_fc_kernel,
        out_shape=jax.ShapeDtypeStruct((c_dim, n_pad), jnp.float32),
        grid_spec=pltpu.PrefetchScalarGridSpec(
            num_scalar_prefetch=0,
            grid=(n_pad // tm,),
            in_specs=[
                pl.BlockSpec((tm, d), lambda i: (i, 0)),       # feats: streamed per tile
                pl.BlockSpec((c_dim, d), lambda i: (0, 0)),    # W: VMEM-resident
                pl.BlockSpec((c_dim, 1), lambda i: (0, 0)),    # b: VMEM-resident
            ],
            out_specs=pl.BlockSpec((c_dim, tm), lambda i: (0, i)),
        ),
        compiler_params=pltpu.CompilerParams(
            dimension_semantics=("parallel",),     # megacore sharding on v7x
            vmem_limit_bytes=32 * 1024 * 1024,     # explicit headroom (safe on all gens)
        ),
    )(feats_in, w_f32, b_col)

    c = ct[:, :n].T            # tiny [C, N] -> [N, C] transpose in the wrapper
    return feats, c


if __name__ == "__main__":
    # 256 instances of 2x16x16 "features" -> feature_size = 512, output_class = 2.
    N, CH, HH, WW = 256, 2, 16, 16
    D = CH * HH * WW
    C = 2

    key = jax.random.PRNGKey(0)
    kx, kw, kb = jax.random.split(key, 3)

    x = jax.random.normal(kx, (N, CH, HH, WW), jnp.float32)

    # Deterministic nn.Linear-style init (uniform, 1/sqrt(fan_in) scale).
    bnd = 1.0 / math.sqrt(D)
    w = jax.random.uniform(kw, (C, D), jnp.float32, -bnd, bnd)   # Linear.weight [C, D]
    b = jax.random.uniform(kb, (C,), jnp.float32, -bnd, bnd)     # Linear.bias   [C]

    feats, c = jax.block_until_ready(iclassifier_forward(x, w, b))

    # Pure-JAX reference of the same forward pass.
    feats_ref = x.reshape(N, -1)
    c_ref = feats_ref @ w.T + b

    assert feats.shape == (N, D) and c.shape == (N, C)
    assert jnp.allclose(feats, feats_ref, atol=1e-6, rtol=1e-6)
    assert jnp.allclose(c, c_ref, atol=1e-5, rtol=1e-5)

    print("KERNEL_OK")
</pallas_src>

<mosaic_0001>
module attributes {stable_mosaic.version = 11 : i64} {
  func.func @iclassifier_fc_kernel(%arg0: i32, %arg1: memref<128x512xf32, #tpu.memory_space<vmem>>, %arg2: memref<2x512xf32, #tpu.memory_space<vmem>>, %arg3: memref<2x1xf32, #tpu.memory_space<vmem>>, %arg4: memref<2x128xf32, #tpu.memory_space<vmem>>) attributes {dimension_semantics = [#tpu.dimension_semantics<parallel>], iteration_bounds = array<i64: 2>, scalar_prefetch = 0 : i64, scratch_operands = 0 : i64, tpu.core_type = #tpu.core_type<tc>, window_params = [{transform_indices = @transform_0, window_bounds = array<i64: 128, 512>}, {pipeline_mode = #tpu.pipeline_mode<synchronous>, transform_indices = @transform_1, window_bounds = array<i64: 2, 512>}, {pipeline_mode = #tpu.pipeline_mode<synchronous>, transform_indices = @transform_2, window_bounds = array<i64: 2, 1>}, {transform_indices = @transform_3, window_bounds = array<i64: 2, 128>}]} {
    %c0 = arith.constant 0 : index
    %c0_0 = arith.constant 0 : index
    %0 = vector.load %arg2[%c0, %c0_0] : memref<2x512xf32, #tpu.memory_space<vmem>>, vector<2x512xf32>
    %c0_1 = arith.constant 0 : index
    %c0_2 = arith.constant 0 : index
    %1 = vector.load %arg1[%c0_1, %c0_2] : memref<128x512xf32, #tpu.memory_space<vmem>>, vector<128x512xf32>
    %cst = arith.constant dense<0.000000e+00> : vector<2x128xf32>
    %2 = tpu.matmul %0, %1, %cst {dimension_numbers = #tpu.dot_dimension_numbers<[1], [1], [0], [0], [0, 0, 1, 0], [], []>} : vector<2x512xf32>, vector<128x512xf32>, vector<2x128xf32> -> vector<2x128xf32>
    %c0_3 = arith.constant 0 : index
    %c0_4 = arith.constant 0 : index
    %3 = vector.load %arg3[%c0_3, %c0_4] : memref<2x1xf32, #tpu.memory_space<vmem>>, vector<2x1xf32>
    %4 = vector.broadcast %3 : vector<2x1xf32> to vector<2x128xf32>
    %5 = arith.addf %2, %4 : vector<2x128xf32>
    %c0_5 = arith.constant 0 : index
    %c0_6 = arith.constant 0 : index
    %6 = vector.load %arg4[%c0_5, %c0_6] : memref<2x128xf32, #tpu.memory_space<vmem>>, vector<2x128xf32>
    tpu.vector_store %arg4[%c0_5, %c0_6], %5 {strides = array<i32>} : memref<2x128xf32, #tpu.memory_space<vmem>>, vector<2x128xf32>,
    return
  }
  func.func @transform_0(%arg0: i32) -> (i32, i32) {
    %c0_i32 = arith.constant 0 : i32
    %c0_i32_0 = arith.constant 0 : i32
    return %arg0, %c0_i32 : i32, i32
  }
  func.func @transform_1(%arg0: i32) -> (i32, i32) {
    %c0_i32 = arith.constant 0 : i32
    %c0_i32_0 = arith.constant 0 : i32
    %c0_i32_1 = arith.constant 0 : i32
    return %c0_i32, %c0_i32_0 : i32, i32
  }
  func.func @transform_2(%arg0: i32) -> (i32, i32) {
    %c0_i32 = arith.constant 0 : i32
    %c0_i32_0 = arith.constant 0 : i32
    %c0_i32_1 = arith.constant 0 : i32
    return %c0_i32, %c0_i32_0 : i32, i32
  }
  func.func @transform_3(%arg0: i32) -> (i32, i32) {
    %c0_i32 = arith.constant 0 : i32
    %c0_i32_0 = arith.constant 0 : i32
    return %c0_i32, %arg0 : i32, i32
  }
}

</mosaic_0001>

<bundles_post_ra>
// kernel: tpu_custom_call.1
= control target key start
LH: loop header
LB: loop body
LE: loop exit
PB: predicated region body
PF: predicated region fallthrough
CT: control target
= control target key end

     0   :  { %8 = vsyncpa [#allocation3], 0  ;;  %s913_s0 = inlined_call_operand.hbm [shape: f32[256,512], index: 0, kind: input, shape index: {}]   ;;  %s914_s1 = inlined_call_operand.hbm [shape: f32[2,512], index: 1, kind: input, shape index: {}]   ;;  %s915_s2 = inlined_call_operand.vmem [shape: f32[2,1], index: 2, kind: input, shape index: {}]   ;;  %s916_s3 = inlined_call_operand.hbm [shape: f32[2,256], index: 3, kind: output, shape index: {}]  }
   0x1   :  { %10 = vsyncpa [#allocation3 + $0x1], 0 }
   0x2   :  { %11 = vsyncpa [#allocation6], 0 }
   0x3   :  { %12 = vsyncpa [#allocation4], 0 }
   0x4   :  { %14 = vsyncpa [#allocation4 + $0x1], 0  ;;  %s701_s12 = smov 0   ;;  %s703_s13 = smov 0  }
   0x5   :  { %s705_s14 = smov 0   ;;  %s707_s15 = smov 0  }
   0x6 LB: > { %s722_s16 = sadd.s32 4294967295, %s675_s15   ;;  %s466_s17 = sadd.s32 4294967294, %s675_s15   ;;  %s675_s15 = sphi %s707_s15, %s927_s15   ;;  %s671_s14 = sphi %s705_s14, %s926_s14   ;;  %s667_s13 = sphi %s703_s13, %s925_s13   ;;  %s663_s12 = sphi %s701_s12, %s924_s12  }
   0x7   : > { %s726_s18 = sadd.s32 1, %s675_s15   ;;  %s27_s19 = sadd.s32 1, %s671_s14 }
   0x8   : > { %s24_s20 = ssub.s32 %s675_s15, %s726_s18  ;;  %p34_p0 = scmp.ne.s32.totalorder %s671_s14, %s667_s13 }
   0x9   : > { %p25_p1 = scmp.eq.s32.totalorder %s24_s20, 0  ;;  %p35_p2 = scmp.eq.s32.totalorder %s675_s15, 0 }
   0xa   : > { %p40_p3 = scmp.ne.s32.totalorder %s667_s13, %s663_s12  ;;  %p41_p4 = scmp.eq.s32.totalorder %s722_s16, 0 }
   0xb   : > { %s738_s21 = scalar_select %p25_p1, %s671_s14, %s27_s19  }
   0xc   : > { %p740_p5 = por %p35_p2, %p34_p0  ;;  %p746_p6 = por %p41_p4, %p40_p3 }
   0xd   : > { %p106_p7 = scmp.eq.s32.totalorder %s722_s16, 1  ;;  %p112_p8 = scmp.eq.s32.totalorder %s466_s17, 1 }
   0xe   : > { %p467_p9 = scmp.ge.s32.totalorder %s675_s15, 1  ;;  %p119_p10 = scmp.lt.s32.totalorder %s675_s15, 3 }
   0xf   : > { %p753_p11 = por %p106_p7, %p34_p0  ;;  %p757_p12 = por %p112_p8, %p40_p3 }
  0x10   : > { %p761_p13 = pnand %p467_p9, %p119_p10  ;;  %s131_s29 = sshll.u32 %s914_s1, 4  ;;  %s132_s29 = int_to_ptr.hbm [resolvable:$true] %s131_s29 }
  0x11   : > { %s677_s30 = smov [#allocation5]   ;;  %p505_p3 = scmp.lt.s32.totalorder %s675_s15, 2 }
  0x12   : > { %p492_p1 = pneg %p761_p13  ;;  %s133_s4 = sshll.u32 %s677_s30, 4  ;;  %s134_s4 = int_to_ptr.vmem [resolvable:$true] %s133_s4 }
  0x13   : > { %s147_s5 = sand.u32 1, %s671_s14   ;;  %p777_p7 = pnand %p505_p3, %p740_p5 }
  0x14   : > { %p493_p2 = pnand %p492_p1, %p41_p4  ;;  %s470_s7 = sshll.u32 %s147_s5, 9 }
  0x15   : > { %s483_s8 = sshll.u32 %s675_s15, 9  ;;  %s151_s19 = scalar_lea.vmem [#allocation2], %s470_s7 }
  0x16   : > { %495 = dma.hbm_to_vmem [thread:$0]  (!%p493_p2), %s132_s29, 128, %s134_s4, [#allocation6]  }
  0x17   : > { %s157_s11 = scalar_lea.hbm %s913_s0, %s483_s8  ;;  %s160_s20 = sshll.u32 %s151_s19, 4  ;;  %s161_s20 = int_to_ptr.vmem [resolvable:$true] %s160_s20 }
  0x18   : > { %s158_s17 = sshll.u32 %s157_s11, 4  ;;  %s148_s27 = scalar_lea.sflag [#allocation3], %s147_s5  ;;  %s159_s17 = int_to_ptr.hbm [resolvable:$true] %s158_s17 }
  0x19   : > { %s575_s28 = sshra.s32 %s159_s17, 4  ;;  %p579_p8 = pneg %p777_p7  ;;  %s576_s28 = int_to_ptr.hbm [resolvable:$true] %s575_s28 }
  0x1a   : > { %s577_s22 = scalar_lea.hbm %s576_s28, 512  ;;  %s582_s4 = scalar_lea.hbm %s913_s0, 1024 }
  0x1b   : > { %p578_p5 = scmp.ne.s32.totalorder %s576_s28, %s577_s22  ;;  %p583_p1 = scmp.lt.s32.totalorder %s576_s28, %s913_s0 }
  0x1c   : > { %p584_p2 = scmp.lt.s32.totalorder %s582_s4, %s577_s22 }
  0x1d   : > { %p580_p9 = pnand %p579_p8, %p578_p5 }
  0x1e   : > { %p585_p3 = por %p584_p2, %p583_p1 }
  0x1f   : > { %p581_p10 = pneg %p580_p9 }
  0x21   : > { %p586_p0 = pnand %p585_p3, %p581_p10 }
  0x23   : > { %589 = shalt.err (!%p586_p0)
}
  0x24   : > { %s678_s5 = smov 512   ;;  %s679_s7 = smov 32  }
  0x25   : > { %499 = dma.hbm_to_vmem [thread:$0]  (!%p777_p7), %s159_s17, 8192, %s161_s20, %s148_s27, %s678_s5, %s678_s5, %s679_s7  }
  0x26   : > { %172 = sbr.rel (%p761_p13) target bundleno = 249 (0xf9), region = 32  ;;  %s798_s10 = sand.u32 (!%p761_p13), 1, %s667_s13  }
  0x27   : > { %s475_s11 = sshll.u32 (!%p761_p13), %s798_s10, 9  ;;  %s175_s19 = scalar_lea.sflag (!%p761_p13), [#allocation3], %s798_s10 }
  0x28   : > { %s802_s28 = scalar_lea.vmem (!%p761_p13), [#allocation2], %s475_s11 }
  0x2b   : > { %650 = dma.done.wait (%p746_p6), %s175_s19, 8192  }
  0x2c   : > { %652 = vsyncadd (%p746_p6), %s175_s19, 4294959104 }
  0x2d   : > { %654 = dma.done.wait (%p41_p4), [#allocation6], 128  }
  0x2e   : > { %656 = vsyncadd (%p41_p4), [#allocation6], 4294967168  ;;  %v271_v0 = vld [vmem:[%s802_s28 + $0x1f0] sm:$0xff]  ;;  %v269_v1 = vld [vmem:[%s802_s28 + $0x1e0] sm:$0xff]  ;;  %v680_v42 = vmov 0   ;;  %s477_s6 = sshll.u32 %s798_s10, 1 }
  0x2f   : > { %v272_v2 = vld [vmem:[%s802_s28 + $0x1f8] sm:$0xff]  ;;  %329 = vmatpush.xpose.msra.mxu2 %v271_v0  ;;  %289 = vmatpush.xpose.msra.mxu0 %v269_v1  ;;  %v270_v3 = vld [vmem:[%s802_s28 + $0x1e8] sm:$0xff]  ;;  %v267_v4 = vld [vmem:[%s802_s28 + $0x1d0] sm:$0xff]  ;;  %s479_s17 = sshll.u32 %s722_s16, 1  ;;  %s206_s29 = scalar_lea.vmem [#allocation7], %s477_s6 }
  0x30   : > { %349 = vmatpush.xpose.msra.mxu3 %v272_v2  ;;  %309 = vmatpush.xpose.msra.mxu1 %v270_v3  ;;  %v265_v5 = vld [vmem:[%s802_s28 + $0x1c0] sm:$0xff]  ;;  %v268_v6 = vld [vmem:[%s802_s28 + $0x1d8] sm:$0xff]  ;;  %v266_v7 = vld [vmem:[%s802_s28 + $0x1c8] sm:$0xff]  ;;  %s381_s22 = scalar_lea.hbm %s916_s3, %s479_s17  ;;  %s383_s30 = sshll.u32 %s206_s29, 4  ;;  %s384_s30 = int_to_ptr.vmem [resolvable:$true] %s383_s30 }
  0x31   : > { %v263_v8 = vld [vmem:[%s802_s28 + $0x1b0] sm:$0xff]  ;;  %v261_v9 = vld [vmem:[%s802_s28 + $0x1a0] sm:$0xff]  ;;  %v264_v10 = vld [vmem:[%s802_s28 + $0x1b8] sm:$0xff]  ;;  %544 = vset.pattern.permute.xlu0 %v680_v42  ;;  %s385_s4 = sshll.u32 %s381_s22, 4  ;;  %s371_s9 = scalar_lea.sflag [#allocation4], %s798_s10  ;;  %s386_s4 = int_to_ptr.hbm [resolvable:$true] %s385_s4 }
  0x32   : > { %v262_v11 = vld [vmem:[%s802_s28 + $0x1a8] sm:$0xff]  ;;  %v259_v12 = vld [vmem:[%s802_s28 + $0x190] sm:$0xff]  ;;  %v257_v13 = vld [vmem:[%s802_s28 + $0x180] sm:$0xff]  ;;  %s619_s16 = sshra.s32 %s386_s4, 4  ;;  %s625_s11 = scalar_lea.hbm %s916_s3, 4  ;;  %s620_s16 = int_to_ptr.hbm [resolvable:$true] %s619_s16 }
  0x33   : > { %330 = vmatpush.xpose.msra.mxu2 %v267_v4  ;;  %290 = vmatpush.xpose.msra.mxu0 %v265_v5  ;;  %v260_v14 = vld [vmem:[%s802_s28 + $0x198] sm:$0xff]  ;;  %v258_v15 = vld [vmem:[%s802_s28 + $0x188] sm:$0xff]  ;;  %v255_v16 = vld [vmem:[%s802_s28 + $0x170] sm:$0xff]  ;;  %s621_s8 = scalar_lea.hbm %s620_s16, 2  ;;  %p626_p0 = scmp.lt.s32.totalorder %s620_s16, %s916_s3 }
  0x34   : > { %350 = vmatpush.xpose.msra.mxu3 %v268_v6  ;;  %310 = vmatpush.xpose.msra.mxu1 %v266_v7  ;;  %v253_v17 = vld [vmem:[%s802_s28 + $0x160] sm:$0xff]  ;;  %v256_v18 = vld [vmem:[%s802_s28 + $0x178] sm:$0xff]  ;;  %v254_v19 = vld [vmem:[%s802_s28 + $0x168] sm:$0xff]  ;;  %p622_p4 = scmp.ne.s32.totalorder %s620_s16, %s621_s8  ;;  %p627_p7 = scmp.lt.s32.totalorder %s625_s11, %s621_s8 }
  0x35   : > { %v251_v20 = vld [vmem:[%s802_s28 + $0x150] sm:$0xff]  ;;  %v249_v21 = vld [vmem:[%s802_s28 + $0x140] sm:$0xff]  ;;  %v252_v22 = vld [vmem:[%s802_s28 + $0x158] sm:$0xff] }
  0x36   : > { %v250_v23 = vld [vmem:[%s802_s28 + $0x148] sm:$0xff]  ;;  %v247_v24 = vld [vmem:[%s802_s28 + $0x130] sm:$0xff]  ;;  %v245_v25 = vld [vmem:[%s802_s28 + $0x120] sm:$0xff]  ;;  %p623_p6 = pnand %p622_p4, %p753_p11  ;;  %p628_p5 = por %p627_p7, %p626_p0 }
  0x37   : > { %331 = vmatpush.xpose.msra.mxu2 %v263_v8  ;;  %291 = vmatpush.xpose.msra.mxu0 %v261_v9  ;;  %v248_v26 = vld [vmem:[%s802_s28 + $0x138] sm:$0xff]  ;;  %v246_v27 = vld [vmem:[%s802_s28 + $0x128] sm:$0xff]  ;;  %v208_v28 = vld [vmem:[#allocation5] sm:$0xff] }
  0x38   : > { %351 = vmatpush.xpose.msra.mxu3 %v264_v10  ;;  %311 = vmatpush.xpose.msra.mxu1 %v262_v11  ;;  %280 = vst [vmem:[#allocation1] ss:$4 sm:$0xff] %v208_v28  ;;  %v243_v29 = vld [vmem:[%s802_s28 + $0x110] sm:$0xff]  ;;  %v241_v30 = vld [vmem:[%s802_s28 + $0x100] sm:$0xff]  ;;  %v244_v31 = vld [vmem:[%s802_s28 + $0x118] sm:$0xff]  ;;  %p624_p13 = pneg %p623_p6 }
  0x39   : > { %v242_v32 = vld [vmem:[%s802_s28 + $0x108] sm:$0xff]  ;;  %v239_v33 = vld [vmem:[%s802_s28 + $0xf0] sm:$0xff]  ;;  %v237_v34 = vld [vmem:[%s802_s28 + $0xe0] sm:$0xff] }
  0x3a   : > { %v240_v35 = vld [vmem:[%s802_s28 + $0xf8] sm:$0xff]  ;;  %v238_v36 = vld [vmem:[%s802_s28 + $0xe8] sm:$0xff]  ;;  %v235_v37 = vld [vmem:[%s802_s28 + $0xd0] sm:$0xff]  ;;  %p629_p8 = pnand %p628_p5, %p624_p13 }
  0x3b   : > { %332 = vmatpush.xpose.msra.mxu2 %v259_v12  ;;  %292 = vmatpush.xpose.msra.mxu0 %v257_v13  ;;  %v233_v38 = vld [vmem:[%s802_s28 + $0xc0] sm:$0xff]  ;;  %v273_v39 = vld [vmem:[%s915_s2] sm:$0x3]  ;;  %v234_v41 = vld [vmem:[%s802_s28 + $0xc8] sm:$0xff] }
  0x3c   : > { %352 = vmatpush.xpose.msra.mxu3 %v260_v14  ;;  %312 = vmatpush.xpose.msra.mxu1 %v258_v15  ;;  %v236_v40 = vld [vmem:[%s802_s28 + $0xd8] sm:$0xff]  ;;  %v231_v43 = vld [vmem:[%s802_s28 + $0xb0] sm:$0xff]  ;;  %v229_v44 = vld [vmem:[%s802_s28 + $0xa0] sm:$0xff] }
  0x3d   : > { %276 = vperm.xlu0 %544, %v273_v39   ;;  %v232_v45 = vld [vmem:[%s802_s28 + $0xb8] sm:$0xff]  ;;  %v230_v46 = vld [vmem:[%s802_s28 + $0xa8] sm:$0xff]  ;;  %v227_v47 = vld [vmem:[%s802_s28 + $0x90] sm:$0xff] }
  0x3e   : > { %v225_v48 = vld [vmem:[%s802_s28 + $0x80] sm:$0xff]  ;;  %v228_v49 = vld [vmem:[%s802_s28 + $0x98] sm:$0xff]  ;;  %v226_v50 = vld [vmem:[%s802_s28 + $0x88] sm:$0xff] }
  0x3f   : > { %333 = vmatpush.xpose.msra.mxu2 %v255_v16  ;;  %293 = vmatpush.xpose.msra.mxu0 %v253_v17  ;;  %v223_v51 = vld [vmem:[%s802_s28 + $0x70] sm:$0xff]  ;;  %v221_v52 = vld [vmem:[%s802_s28 + $0x60] sm:$0xff]  ;;  %v224_v53 = vld [vmem:[%s802_s28 + $0x78] sm:$0xff] }
  0x40   : > { %353 = vmatpush.xpose.msra.mxu3 %v256_v18  ;;  %313 = vmatpush.xpose.msra.mxu1 %v254_v19  ;;  %v222_v54 = vld [vmem:[%s802_s28 + $0x68] sm:$0xff]  ;;  %v219_v55 = vld [vmem:[%s802_s28 + $0x50] sm:$0xff]  ;;  %v217_v56 = vld [vmem:[%s802_s28 + $0x40] sm:$0xff] }
  0x41   : > { %v220_v57 = vld [vmem:[%s802_s28 + $0x58] sm:$0xff]  ;;  %v218_v58 = vld [vmem:[%s802_s28 + $0x48] sm:$0xff]  ;;  %v215_v59 = vld [vmem:[%s802_s28 + $0x30] sm:$0xff] }
  0x42   : > { %v213_v60 = vld [vmem:[%s802_s28 + $0x20] sm:$0xff]  ;;  %v216_v61 = vld [vmem:[%s802_s28 + $0x38] sm:$0xff]  ;;  %v214_v62 = vld [vmem:[%s802_s28 + $0x28] sm:$0xff] }
  0x43   : > { %334 = vmatpush.xpose.msra.mxu2 %v251_v20  ;;  %294 = vmatpush.xpose.msra.mxu0 %v249_v21  ;;  %v211_v63 = vld [vmem:[%s802_s28 + $0x10] sm:$0xff]  ;;  %v209_v0 = vld [vmem:[%s802_s28] sm:$0xff]  ;;  %v212_v1 = vld [vmem:[%s802_s28 + $0x18] sm:$0xff] }
  0x44   : > { %354 = vmatpush.xpose.msra.mxu3 %v252_v22  ;;  %314 = vmatpush.xpose.msra.mxu1 %v250_v23  ;;  %v210_v2 = vld [vmem:[%s802_s28 + $0x8] sm:$0xff]  ;;  %v281_v4 = vld.sshfl [vmem:[#allocation1] sm:$0xff pattern:$0x73625140] }
  0x45   : > { %v283_v3 = vld.sshfl [vmem:[#allocation1 + $0x10] sm:$0xff pattern:$0x73625140]  ;;  %v284_v5 = vld.sshfl [vmem:[#allocation1 + $0x18] sm:$0xff pattern:$0x73625140] }
  0x46   : > { %v282_v6 = vld.sshfl [vmem:[#allocation1 + $0x8] sm:$0xff pattern:$0x73625140] }
  0x47   : > { %335 = vmatpush.xpose.msra.mxu2 %v247_v24  ;;  %295 = vmatpush.xpose.msra.mxu0 %v245_v25 }
  0x48   : > { %355 = vmatpush.xpose.msra.mxu3 %v248_v26  ;;  %315 = vmatpush.xpose.msra.mxu1 %v246_v27 }
  0x4b   : > { %336 = vmatpush.xpose.msra.mxu2 %v243_v29  ;;  %296 = vmatpush.xpose.msra.mxu0 %v241_v30 }
  0x4c   : > { %356 = vmatpush.xpose.msra.mxu3 %v244_v31  ;;  %316 = vmatpush.xpose.msra.mxu1 %v242_v32 }
  0x4f   : > { %337 = vmatpush.xpose.msra.mxu2 %v239_v33  ;;  %297 = vmatpush.xpose.msra.mxu0 %v237_v34 }
  0x50   : > { %357 = vmatpush.xpose.msra.mxu3 %v240_v35  ;;  %317 = vmatpush.xpose.msra.mxu1 %v238_v36 }
  0x53   : > { %338 = vmatpush.xpose.msra.mxu2 %v235_v37  ;;  %298 = vmatpush.xpose.msra.mxu0 %v233_v38 }
  0x54   : > { %358 = vmatpush.xpose.msra.mxu3 %v236_v40  ;;  %318 = vmatpush.xpose.msra.mxu1 %v234_v41 }
  0x57   : > { %339 = vmatpush.xpose.msra.mxu2 %v231_v43  ;;  %299 = vmatpush.xpose.msra.mxu0 %v229_v44 }
  0x58   : > { %359 = vmatpush.xpose.msra.mxu3 %v232_v45  ;;  %319 = vmatpush.xpose.msra.mxu1 %v230_v46 }
  0x5b   : > { %340 = vmatpush.xpose.msra.mxu2 %v227_v47  ;;  %300 = vmatpush.xpose.msra.mxu0 %v225_v48 }
  0x5c   : > { %360 = vmatpush.xpose.msra.mxu3 %v228_v49  ;;  %320 = vmatpush.xpose.msra.mxu1 %v226_v50 }
  0x5f   : > { %341 = vmatpush.xpose.msra.mxu2 %v223_v51  ;;  %301 = vmatpush.xpose.msra.mxu0 %v221_v52 }
  0x60   : > { %361 = vmatpush.xpose.msra.mxu3 %v224_v53  ;;  %321 = vmatpush.xpose.msra.mxu1 %v222_v54 }
  0x63   : > { %342 = vmatpush.xpose.msra.mxu2 %v219_v55  ;;  %302 = vmatpush.xpose.msra.mxu0 %v217_v56 }
  0x64   : > { %362 = vmatpush.xpose.msra.mxu3 %v220_v57  ;;  %322 = vmatpush.xpose.msra.mxu1 %v218_v58 }
  0x67   : > { %343 = vmatpush.xpose.msra.mxu2 %v215_v59  ;;  %303 = vmatpush.xpose.msra.mxu0 %v213_v60 }
  0x68   : > { %363 = vmatpush.xpose.msra.mxu3 %v216_v61  ;;  %323 = vmatpush.xpose.msra.mxu1 %v214_v62 }
  0x6b   : > { %344 = vmatpush.xpose.msra.mxu2 %v211_v63  ;;  %304 = vmatpush.xpose.msra.mxu0 %v209_v0 }
  0x6c   : > { %364 = vmatpush.xpose.msra.mxu3 %v212_v1  ;;  %324 = vmatpush.xpose.msra.mxu1 %v210_v2 }
  0x6e   : > { %345 = vmatmul.f32.vlgmr.msra.gmra.mxu2 %v283_v3  ;;  %305 = vmatmul.f32.vlgmr.msra.gmra.mxu0 %v281_v4 }
  0x6f   : > { %365 = vmatmul.f32.vlgmr.msra.gmra.mxu3 %v284_v5  ;;  %325 = vmatmul.f32.vlgmr.msra.gmra.mxu1 %v282_v6 }
  0xaf   : > { %v277_v7 = vpop.permute.xlu0 %276 }
  0xeb   : > { %v306_v8 = vpop.f32.mrf.mxu0 }
  0xec   : > { %v307_v9 = vadd.f32 %v306_v8, %v277_v7  ;;  %v326_v10 = vpop.f32.mrf.mxu1 }
  0xee   : > { %v327_v11 = vadd.f32 %v326_v10, %v307_v9 }
  0xf1   : > { %v346_v12 = vpop.f32.mrf.mxu2 }
  0xf2   : > { %v347_v13 = vadd.f32 %v346_v12, %v327_v11  ;;  %v366_v14 = vpop.f32.mrf.mxu3 }
  0xf4   : > { %v367_v15 = vadd.f32 %v366_v14, %v347_v13 }
  0xf6   : > { %369 = vst [vmem:[%s206_s29] sm:$0x3] %v367_v15 }
  0xf7   : > { %632 = shalt.err (!%p629_p8)
}
  0xf8   : > { %490 = dma.vmem_to_hbm [thread:$0]  (%p753_p11), %s384_s30, 32, %s386_s4, %s371_s9  }
  0xf9 PF: > { %s397_s10 = sand.u32 1, %s663_s12   ;;  %p923_p9 = scmp.ge.s32.totalorder %s675_s15, 2 }
  0xfa   : > { %s398_s23 = scalar_lea.sflag [#allocation4], %s397_s10 }
  0xfb   : > { %p501_p10 = pnand %p923_p9, %p757_p12 }
  0xfd   : > { %p502_p1 = pneg %p501_p10 }
  0xff   : > { %658 = dma.done.wait (%p502_p1), %s398_s23, 32  }
 0x100   : > { %660 = vsyncadd (%p502_p1), %s398_s23, 4294967264  ;;  %p17_p2 = scmp.ge.s32.totalorder %s726_s18, 4   ;;  %s924_s12 = smov %s667_s13 }
 0x101   : > { %s925_s13 = smov %s671_s14  ;;  %s926_s14 = smov %s738_s21 }
 0x102   : > { %s927_s15 = smov %s726_s18  ;;  %19 = sbr.rel (!%p17_p2) target bundleno = 6 (0x6), region = 81 }
 0x107   :  { %404 = vsyncpa [#allocation3], 1 }
 0x108   :  { %406 = vsyncpa [#allocation3 + $0x1], 1 }
 0x109   :  { %407 = vsyncpa [#allocation6], 1 }
 0x10a   :  { %408 = vsyncpa [#allocation4], 1 }
 0x10b   :  { %410 = vsyncpa [#allocation4 + $0x1], 1 }

</bundles_post_ra>
